<compile_context>
chip_gen: v6e
topology: v6e:2x2x1
jax: 0.10.0
libtpu: 0.0.40
codegen_flags: <defaults>
</compile_context>

<pallas_src>
import jax
import jax.numpy as jnp
from jax.experimental import pallas as pl
from jax.experimental.pallas import tpu as pltpu


def _round_up(x, m):
    return (x + m - 1) // m * m


def _linear_eval_kernel(x_ref, w2_ref, bb_ref, wct_ref, bc_ref,
                        feat_ref, logits_ref):
    # x_ref:   (TB, C*H*W)  activation tile (input dtype, e.g. bf16/f32)
    # w2_ref:  (C*H*W, Dp)  backbone weight with the 1/(H*W) mean folded in
    # bb_ref:  (1, Dp)      backbone bias (f32, zero-padded)
    # wct_ref: (Dp, Np)     classifier weight, pre-transposed + zero-padded
    # bc_ref:  (1, Np)      classifier bias (f32, zero-padded)

    # Fused GAP + backbone linear: a single big-K MXU matmul, f32 accumulate.
    feats = jnp.dot(x_ref[...], w2_ref[...],
                    preferred_element_type=jnp.float32) + bb_ref[...]
    feats = jnp.maximum(feats, 0.0)          # ReLU in f32 on the VPU (v5e-safe)
    # feature_map is part of the module's return value, so it is written back
    # (a second lane-dense (TB, Dp) HBM store stream per tile, by design).
    feat_ref[...] = feats.astype(feat_ref.dtype)

    # Classifier: nn.Linear(input_dim, n_classes).  detach_cls only affects
    # gradients; the forward value is identical.
    logits = jnp.dot(feats, wct_ref[...],
                     preferred_element_type=jnp.float32) + bc_ref[...]
    logits_ref[...] = logits.astype(logits_ref.dtype)


def prepare_linear_eval_weights(wb, bb, wc, bc, *, spatial,
                                param_dtype=jnp.float32):
    """One-time weight prep (call once, outside the per-batch hot path).

    wb: (C, D) backbone projection.  bb: (D,).
    wc: (n_classes, D) as nn.Linear.weight.  bc: (n_classes,).
    spatial: H*W of the inputs the backbone will see.
    """
    C, D = wb.shape
    n_classes = wc.shape[0]
    Dp = _round_up(D, 128)
    Np = _round_up(n_classes, 128)
    # Fold the global-average-pool (1/spatial) into the backbone weight and
    # repeat per spatial location so the kernel does one big-K MXU matmul.
    # Assumes C*spatial*Dp (param_dtype) fits comfortably in VMEM (true for
    # this stand-in backbone; for huge C*spatial the GAP would stay in-kernel).
    w2 = jnp.repeat(wb.astype(param_dtype) / float(spatial), spatial, axis=0)
    w2 = jnp.pad(w2, ((0, 0), (0, Dp - D)))                        # (C*S, Dp)
    # Biases stay f32: they are added after the f32 accumulation.
    bb_p = jnp.pad(bb.astype(jnp.float32), (0, Dp - D)).reshape(1, Dp)
    wct = jnp.pad(wc.T.astype(param_dtype),
                  ((0, Dp - D), (0, Np - n_classes)))              # (Dp, Np)
    bc_p = jnp.pad(bc.astype(jnp.float32), (0, Np - n_classes)).reshape(1, Np)
    return dict(w2=w2, bb=bb_p, wct=wct, bc=bc_p,
                D=D, n_classes=n_classes, Dp=Dp, Np=Np, spatial=spatial)


def _choose_batch_tile(B, K, Dp, Np, x_itemsize, w_itemsize,
                       vmem_budget_bytes=24 * 1024 * 1024):
    """Largest batch tile (multiple of 8 sublanes, <=1024) whose
    double-buffered working set stays under a ~24 MiB VMEM budget (fits v7x's
    32 MiB default scoped VMEM as well as v5e/v6e)."""
    # Resident weights/biases (counted double-buffered to be conservative:
    # BlockSpec allocates 2 buffers even for constant-index blocks).
    weight_bytes = 2 * ((K * Dp + Dp * Np) * w_itemsize + (Dp + Np) * 4)
    per_row = 2 * (K * x_itemsize + (Dp + Np) * 4)   # x tile + both outputs
    avail = max(vmem_budget_bytes - weight_bytes, per_row * 8)
    tb = max(8, min(1024, int(avail // per_row) // 8 * 8))
    # Don't tile beyond the (sublane-padded) batch.
    return min(tb, _round_up(B, 8))


def linear_eval_forward(x_nchw, weights, *, detach_cls=True,
                        out_dtype=jnp.float32):
    """x_nchw: (B, C, H, W) in any float dtype (bf16 recommended at real
    shapes -- no host-side upcast is performed).  `weights` comes from
    prepare_linear_eval_weights.  Returns (feature_map, logits)."""
    B, C, H, W = x_nchw.shape
    S = H * W
    assert S == weights["spatial"], "weights prepared for a different spatial size"
    K = C * S
    D, n_classes = weights["D"], weights["n_classes"]
    Dp, Np = weights["Dp"], weights["Np"]

    x2d = x_nchw.reshape(B, K)             # keep the input dtype (no upcast)

    # Keep the MXU on a homogeneous-dtype path: cast the (large) weights to
    # the activation dtype once per call (constant-folded under jit), instead
    # of per-tile upcasting the big activation operand inside the kernel.
    w2 = weights["w2"]
    wct = weights["wct"]
    if w2.dtype != x2d.dtype:
        w2 = w2.astype(x2d.dtype)
        wct = wct.astype(x2d.dtype)

    tb = _choose_batch_tile(B, K, Dp, Np, x2d.dtype.itemsize, w2.dtype.itemsize)
    b_pad = _round_up(B, tb)
    if b_pad != B:
        x2d = jnp.pad(x2d, ((0, b_pad - B), (0, 0)))
    grid = (b_pad // tb,)

    # Advisory cost hint so XLA schedules around the custom call sensibly.
    cost = pl.CostEstimate(
        flops=2 * b_pad * K * Dp + 2 * b_pad * Dp * Np,
        transcendentals=0,
        bytes_accessed=(b_pad * K * x2d.dtype.itemsize
                        + (K * Dp + Dp * Np) * w2.dtype.itemsize
                        + (Dp + Np) * 4
                        + b_pad * (Dp + Np) * jnp.dtype(out_dtype).itemsize),
    )

    feat_p, logits_p = pl.pallas_call(
        _linear_eval_kernel,
        grid=grid,
        in_specs=[
            pl.BlockSpec((tb, K), lambda i: (i, 0)),     # streamed activations
            pl.BlockSpec((K, Dp), lambda i: (0, 0)),     # resident weights
            pl.BlockSpec((1, Dp), lambda i: (0, 0)),
            pl.BlockSpec((Dp, Np), lambda i: (0, 0)),
            pl.BlockSpec((1, Np), lambda i: (0, 0)),
        ],
        out_specs=(
            pl.BlockSpec((tb, Dp), lambda i: (i, 0)),
            pl.BlockSpec((tb, Np), lambda i: (i, 0)),
        ),
        out_shape=(
            jax.ShapeDtypeStruct((b_pad, Dp), out_dtype),
            jax.ShapeDtypeStruct((b_pad, Np), out_dtype),
        ),
        compiler_params=pltpu.CompilerParams(
            dimension_semantics=("parallel",),           # 2 TCs on v7x
            vmem_limit_bytes=32 * 1024 * 1024,
        ),
        cost_estimate=cost,
    )(x2d, w2, weights["bb"], wct, weights["bc"])

    feat = feat_p[:B, :D]
    logits = logits_p[:B, :n_classes]
    if detach_cls:
        # Forward-value no-op; mirrors feature_map.detach() for autodiff on
        # the returned feature_map.
        # TODO(synk): pallas_call has no custom VJP here, so in-kernel
        # classifier grads would not be blocked if this were trained through.
        feat = jax.lax.stop_gradient(feat)
    return feat, logits


if __name__ == "__main__":
    # Small shapes consistent with the module's forward:
    #   xs: (B=2, C=4, H=16, W=16), backbone input_dim=32, n_classes=10
    B, C, H, W = 2, 4, 16, 16
    input_dim, n_classes = 32, 10

    key = jax.random.PRNGKey(0)
    kx, kwb, kbb, kwc, kbc = jax.random.split(key, 5)
    x = jax.random.normal(kx, (B, C, H, W), dtype=jnp.float32)
    wb = jax.random.normal(kwb, (C, input_dim), dtype=jnp.float32) * 0.1
    bb = jax.random.normal(kbb, (input_dim,), dtype=jnp.float32) * 0.01
    wc = jax.random.normal(kwc, (n_classes, input_dim), dtype=jnp.float32) * 0.1
    bc = jax.random.normal(kbc, (n_classes,), dtype=jnp.float32) * 0.01

    # One-time weight prep (outside the per-batch hot path).
    weights = prepare_linear_eval_weights(wb, bb, wc, bc, spatial=H * W)

    feat, logits = linear_eval_forward(x, weights, detach_cls=True)
    jax.block_until_ready((feat, logits))

    # Reference check in plain JAX.
    pooled_ref = jnp.mean(x.reshape(B, C, H * W), axis=-1)
    feat_ref = jnp.maximum(pooled_ref @ wb + bb, 0.0)
    logits_ref = feat_ref @ wc.T + bc
    assert feat.shape == (B, input_dim) and logits.shape == (B, n_classes)
    assert jnp.allclose(feat, feat_ref, atol=1e-4, rtol=1e-4), "feature mismatch"
    assert jnp.allclose(logits, logits_ref, atol=1e-4, rtol=1e-4), "logits mismatch"

    print("KERNEL_OK")
</pallas_src>

<mosaic_0001>
module attributes {stable_mosaic.version = 11 : i64} {
  func.func @_linear_eval_kernel(%arg0: i32, %arg1: memref<8x1024xf32, #tpu.memory_space<vmem>>, %arg2: memref<1024x128xf32, #tpu.memory_space<vmem>>, %arg3: memref<1x128xf32, #tpu.memory_space<vmem>>, %arg4: memref<128x128xf32, #tpu.memory_space<vmem>>, %arg5: memref<1x128xf32, #tpu.memory_space<vmem>>, %arg6: memref<8x128xf32, #tpu.memory_space<vmem>>, %arg7: memref<8x128xf32, #tpu.memory_space<vmem>>) attributes {dimension_semantics = [#tpu.dimension_semantics<parallel>], iteration_bounds = array<i64: 1>, scalar_prefetch = 0 : i64, scratch_operands = 0 : i64, tpu.core_type = #tpu.core_type<tc>, window_params = [{transform_indices = @transform_0, window_bounds = array<i64: 8, 1024>}, {pipeline_mode = #tpu.pipeline_mode<synchronous>, transform_indices = @transform_1, window_bounds = array<i64: 1024, 128>}, {pipeline_mode = #tpu.pipeline_mode<synchronous>, transform_indices = @transform_2, window_bounds = array<i64: 1, 128>}, {pipeline_mode = #tpu.pipeline_mode<synchronous>, transform_indices = @transform_3, window_bounds = array<i64: 128, 128>}, {pipeline_mode = #tpu.pipeline_mode<synchronous>, transform_indices = @transform_4, window_bounds = array<i64: 1, 128>}, {transform_indices = @transform_5, window_bounds = array<i64: 8, 128>}, {transform_indices = @transform_6, window_bounds = array<i64: 8, 128>}]} {
    %c0 = arith.constant 0 : index
    %c0_0 = arith.constant 0 : index
    %0 = vector.load %arg1[%c0, %c0_0] : memref<8x1024xf32, #tpu.memory_space<vmem>>, vector<8x1024xf32>
    %c0_1 = arith.constant 0 : index
    %c0_2 = arith.constant 0 : index
    %1 = vector.load %arg2[%c0_1, %c0_2] : memref<1024x128xf32, #tpu.memory_space<vmem>>, vector<1024x128xf32>
    %cst = arith.constant dense<0.000000e+00> : vector<8x128xf32>
    %2 = tpu.matmul %0, %1, %cst {dimension_numbers = #tpu.dot_dimension_numbers<[1], [0], [0], [1], [0, 0, 1, 1], [], []>} : vector<8x1024xf32>, vector<1024x128xf32>, vector<8x128xf32> -> vector<8x128xf32>
    %c0_3 = arith.constant 0 : index
    %c0_4 = arith.constant 0 : index
    %3 = vector.load %arg3[%c0_3, %c0_4] : memref<1x128xf32, #tpu.memory_space<vmem>>, vector<1x128xf32>
    %4 = vector.broadcast %3 : vector<1x128xf32> to vector<8x128xf32>
    %5 = arith.addf %2, %4 : vector<8x128xf32>
    %cst_5 = arith.constant 0.000000e+00 : f32
    %6 = vector.broadcast %cst_5 : f32 to vector<8x128xf32>
    %7 = arith.maximumf %5, %6 : vector<8x128xf32>
    %c0_6 = arith.constant 0 : index
    %c0_7 = arith.constant 0 : index
    %8 = vector.load %arg6[%c0_6, %c0_7] : memref<8x128xf32, #tpu.memory_space<vmem>>, vector<8x128xf32>
    tpu.vector_store %arg6[%c0_6, %c0_7], %7 {strides = array<i32>} : memref<8x128xf32, #tpu.memory_space<vmem>>, vector<8x128xf32>,
    %c0_8 = arith.constant 0 : index
    %c0_9 = arith.constant 0 : index
    %9 = vector.load %arg4[%c0_8, %c0_9] : memref<128x128xf32, #tpu.memory_space<vmem>>, vector<128x128xf32>
    %cst_10 = arith.constant dense<0.000000e+00> : vector<8x128xf32>
    %10 = tpu.matmul %7, %9, %cst_10 {dimension_numbers = #tpu.dot_dimension_numbers<[1], [0], [0], [1], [0, 0, 1, 1], [], []>} : vector<8x128xf32>, vector<128x128xf32>, vector<8x128xf32> -> vector<8x128xf32>
    %c0_11 = arith.constant 0 : index
    %c0_12 = arith.constant 0 : index
    %11 = vector.load %arg5[%c0_11, %c0_12] : memref<1x128xf32, #tpu.memory_space<vmem>>, vector<1x128xf32>
    %12 = vector.broadcast %11 : vector<1x128xf32> to vector<8x128xf32>
    %13 = arith.addf %10, %12 : vector<8x128xf32>
    %c0_13 = arith.constant 0 : index
    %c0_14 = arith.constant 0 : index
    %14 = vector.load %arg7[%c0_13, %c0_14] : memref<8x128xf32, #tpu.memory_space<vmem>>, vector<8x128xf32>
    tpu.vector_store %arg7[%c0_13, %c0_14], %13 {strides = array<i32>} : memref<8x128xf32, #tpu.memory_space<vmem>>, vector<8x128xf32>,
    return
  }
  func.func @transform_0(%arg0: i32) -> (i32, i32) {
    %c0_i32 = arith.constant 0 : i32
    %c0_i32_0 = arith.constant 0 : i32
    return %arg0, %c0_i32 : i32, i32
  }
  func.func @transform_1(%arg0: i32) -> (i32, i32) {
    %c0_i32 = arith.constant 0 : i32
    %c0_i32_0 = arith.constant 0 : i32
    %c0_i32_1 = arith.constant 0 : i32
    return %c0_i32, %c0_i32_0 : i32, i32
  }
  func.func @transform_2(%arg0: i32) -> (i32, i32) {
    %c0_i32 = arith.constant 0 : i32
    %c0_i32_0 = arith.constant 0 : i32
    %c0_i32_1 = arith.constant 0 : i32
    return %c0_i32, %c0_i32_0 : i32, i32
  }
  func.func @transform_3(%arg0: i32) -> (i32, i32) {
    %c0_i32 = arith.constant 0 : i32
    %c0_i32_0 = arith.constant 0 : i32
    %c0_i32_1 = arith.constant 0 : i32
    return %c0_i32, %c0_i32_0 : i32, i32
  }
  func.func @transform_4(%arg0: i32) -> (i32, i32) {
    %c0_i32 = arith.constant 0 : i32
    %c0_i32_0 = arith.constant 0 : i32
    %c0_i32_1 = arith.constant 0 : i32
    return %c0_i32, %c0_i32_0 : i32, i32
  }
  func.func @transform_5(%arg0: i32) -> (i32, i32) {
    %c0_i32 = arith.constant 0 : i32
    %c0_i32_0 = arith.constant 0 : i32
    return %arg0, %c0_i32 : i32, i32
  }
  func.func @transform_6(%arg0: i32) -> (i32, i32) {
    %c0_i32 = arith.constant 0 : i32
    %c0_i32_0 = arith.constant 0 : i32
    return %arg0, %c0_i32 : i32, i32
  }
}

</mosaic_0001>

<bundles_post_ra>
// kernel: tpu_custom_call.1
= control target key start
LH: loop header
LB: loop body
LE: loop exit
PB: predicated region body
PF: predicated region fallthrough
CT: control target
= control target key end

     0   :  { %12 = vsyncpa [#allocation3], 0  ;;  %s988_s0 = inlined_call_operand.hbm [shape: f32[8,1024], index: 0, kind: input, shape index: {}]   ;;  %s989_s1 = inlined_call_operand.hbm [shape: f32[1024,128], index: 1, kind: input, shape index: {}]   ;;  %s990_s2 = inlined_call_operand.vmem [shape: f32[1,128], index: 2, kind: input, shape index: {}]   ;;  %s991_s3 = inlined_call_operand.hbm [shape: f32[128,128], index: 3, kind: input, shape index: {}]   ;;  %s992_s4 = inlined_call_operand.vmem [shape: f32[1,128], index: 4, kind: input, shape index: {}]   ;;  %s993_s5 = inlined_call_operand.hbm [shape: f32[8,128], index: 5, kind: output, shape index: {0}]   ;;  %s994_s6 = inlined_call_operand.hbm [shape: f32[8,128], index: 6, kind: output, shape index: {1}]  }
   0x1   :  { %13 = vsyncpa [#allocation6], 0 }
   0x2   :  { %14 = vsyncpa [#allocation4], 0 }
   0x3   :  { %15 = vsyncpa [#allocation10], 0  ;;  %s923_s21 = smov [#allocation5]  }
   0x4   :  { %s31_s22 = sshll.u32 %s923_s21, 4  ;;  %s32_s22 = int_to_ptr.vmem [resolvable:$true] %s31_s22 }
   0x5   :  { %s823_s23 = scalar_lea.vmem %s32_s22, 16384  ;;  %p828_p1 = scmp.lt.s32.totalorder %s32_s22, %s32_s22 }
   0x6   :  { %p824_p0 = scmp.ne.s32.totalorder %s32_s22, %s823_s23  ;;  %p829_p2 = scmp.lt.s32.totalorder %s823_s23, %s823_s23 }
   0x8   :  { %p830_p3 = por %p829_p2, %p828_p1 }
   0xa   :  { %p831_p4 = pnand %p830_p3, %p824_p0 }
   0xc   :  { %834 = shalt.err (!%p831_p4)
}
   0xd   :  { %s924_s24 = smov 128   ;;  %s925_s25 = smov 8  }
   0xe   :  { %37 = dma.hbm_to_vmem [thread:$0]  %s989_s1, 16384, %s32_s22, [#allocation6], %s924_s24, %s924_s24, %s925_s25  }
   0xf   :  { %s926_s28 = smov [#allocation2]   ;;  %s927_s30 = smov [#allocation7]  }
  0x10   :  { %s22_s29 = sshll.u32 %s926_s28, 4  ;;  %s45_s7 = sshll.u32 %s927_s30, 4  ;;  %s23_s29 = int_to_ptr.vmem [resolvable:$true] %s22_s29  ;;  %s46_s7 = int_to_ptr.vmem [resolvable:$true] %s45_s7 }
  0x11   :  { %s843_s8 = scalar_lea.vmem %s23_s29, 1024  ;;  %p848_p6 = scmp.lt.s32.totalorder %s23_s29, %s23_s29 }
  0x12   :  { %p844_p5 = scmp.ne.s32.totalorder %s23_s29, %s843_s8  ;;  %p849_p7 = scmp.lt.s32.totalorder %s843_s8, %s843_s8 }
  0x14   :  { %p850_p8 = por %p849_p7, %p848_p6 }
  0x16   :  { %p851_p9 = pnand %p850_p8, %p844_p5 }
  0x18   :  { %854 = shalt.err (!%p851_p9)
}
  0x19   :  { %25 = dma.hbm_to_vmem [thread:$0]  %s988_s0, 1024, %s23_s29, [#allocation3]  }
  0x1a   :  { %s863_s11 = scalar_lea.vmem %s46_s7, 2048  ;;  %p868_p11 = scmp.lt.s32.totalorder %s46_s7, %s46_s7 }
  0x1b   :  { %p864_p10 = scmp.ne.s32.totalorder %s46_s7, %s863_s11  ;;  %p869_p12 = scmp.lt.s32.totalorder %s863_s11, %s863_s11 }
  0x1d   :  { %p870_p13 = por %p869_p12, %p868_p11 }
  0x1f   :  { %p871_p0 = pnand %p870_p13, %p864_p10 }
  0x21   :  { %874 = shalt.err (!%p871_p0)
}
  0x22   :  { %51 = dma.hbm_to_vmem [thread:$0]  %s991_s3, 2048, %s46_s7, [#allocation6], %s924_s24, %s924_s24, %s925_s25  }
  0x23   :  { %915 = dma.done.wait [#allocation3], 1024  }
  0x24   :  { %916 = vsyncadd [#allocation3], 4294966272 }
  0x25   :  { %917 = dma.done.wait [#allocation6], 18432  }
  0x26   :  { %918 = vsyncadd [#allocation6], 4294948864  ;;  %v102_v0 = vld [vmem:[#allocation5 + $0xf8] sm:$0xff]  ;;  %v101_v4 = vld [vmem:[#allocation5 + $0xf0] sm:$0xff]  ;;  %vm929_vm0 = vmmov 0   ;;  %s930_s13 = smov [#allocation8]  }
  0x27   :  { %v134_v1 = vld [vmem:[#allocation5 + $0x1f8] sm:$0xff]  ;;  %614 = vmatprep.subr.mxu0 %v102_v0  ;;  %v133_v5 = vld [vmem:[#allocation5 + $0x1f0] sm:$0xff]  ;;  %v100_v8 = vld [vmem:[#allocation5 + $0xe8] sm:$0xff]  ;;  %s588_s14 = sshll.u32 %s930_s13, 4  ;;  %s589_s14 = int_to_ptr.vmem [resolvable:$true] %s588_s14 }
  0x28   :  { %v86_v2 = vld [vmem:[#allocation5 + $0x78] sm:$0xff]  ;;  %649 = vmatprep.subr.mxu1 %v134_v1  ;;  %v85_v6 = vld [vmem:[#allocation5 + $0x70] sm:$0xff]  ;;  %v132_v9 = vld [vmem:[#allocation5 + $0x1e8] sm:$0xff]  ;;  %s875_s15 = scalar_lea.vmem %s589_s14, 128  ;;  %p880_p2 = scmp.lt.s32.totalorder %s589_s14, %s589_s14 }
  0x29   :  { %v118_v3 = vld [vmem:[#allocation5 + $0x178] sm:$0xff]  ;;  %615 = vmatpush3.msra.mxu0 %v86_v2  ;;  %v117_v7 = vld [vmem:[#allocation5 + $0x170] sm:$0xff]  ;;  %v84_v10 = vld [vmem:[#allocation5 + $0x68] sm:$0xff]  ;;  %p876_p1 = scmp.ne.s32.totalorder %s589_s14, %s875_s15  ;;  %p881_p3 = scmp.lt.s32.totalorder %s875_s15, %s875_s15 }
  0x2a   :  { %650 = vmatpush3.msra.mxu1 %v118_v3  ;;  %616 = vmatprep.subr.mxu0 %v101_v4  ;;  %v116_v11 = vld [vmem:[#allocation5 + $0x168] sm:$0xff]  ;;  %v99_v12 = vld [vmem:[#allocation5 + $0xe0] sm:$0xff]  ;;  %v98_v16 = vld [vmem:[#allocation5 + $0xd8] sm:$0xff] }
  0x2b   :  { %651 = vmatprep.subr.mxu1 %v133_v5  ;;  %617 = vmatpush3.msra.mxu0 %v85_v6  ;;  %v131_v13 = vld [vmem:[#allocation5 + $0x1e0] sm:$0xff]  ;;  %v130_v17 = vld [vmem:[#allocation5 + $0x1d8] sm:$0xff]  ;;  %v97_v20 = vld [vmem:[#allocation5 + $0xd0] sm:$0xff]  ;;  %p882_p4 = por %p881_p3, %p880_p2 }
  0x2c   :  { %652 = vmatpush3.msra.mxu1 %v117_v7  ;;  %618 = vmatprep.subr.mxu0 %v100_v8  ;;  %v83_v14 = vld [vmem:[#allocation5 + $0x60] sm:$0xff]  ;;  %v82_v18 = vld [vmem:[#allocation5 + $0x58] sm:$0xff]  ;;  %v129_v21 = vld [vmem:[#allocation5 + $0x1d0] sm:$0xff] }
  0x2d   :  { %653 = vmatprep.subr.mxu1 %v132_v9  ;;  %v115_v15 = vld [vmem:[#allocation5 + $0x160] sm:$0xff]  ;;  %619 = vmatpush3.msra.mxu0 %v84_v10  ;;  %v114_v19 = vld [vmem:[#allocation5 + $0x158] sm:$0xff]  ;;  %v81_v22 = vld [vmem:[#allocation5 + $0x50] sm:$0xff]  ;;  %p883_p5 = pnand %p882_p4, %p876_p1 }
  0x2e   :  { %654 = vmatpush3.msra.mxu1 %v116_v11  ;;  %620 = vmatprep.subr.mxu0 %v99_v12  ;;  %v113_v23 = vld [vmem:[#allocation5 + $0x150] sm:$0xff]  ;;  %v96_v24 = vld [vmem:[#allocation5 + $0xc8] sm:$0xff]  ;;  %v95_v28 = vld [vmem:[#allocation5 + $0xc0] sm:$0xff] }
  0x2f   :  { %655 = vmatprep.subr.mxu1 %v131_v13  ;;  %621 = vmatpush3.msra.mxu0 %v83_v14  ;;  %v128_v25 = vld [vmem:[#allocation5 + $0x1c8] sm:$0xff]  ;;  %v127_v29 = vld [vmem:[#allocation5 + $0x1c0] sm:$0xff]  ;;  %v94_v32 = vld [vmem:[#allocation5 + $0xb8] sm:$0xff] }
  0x30   :  { %656 = vmatpush3.msra.mxu1 %v115_v15  ;;  %622 = vmatprep.subr.mxu0 %v98_v16  ;;  %v80_v26 = vld [vmem:[#allocation5 + $0x48] sm:$0xff]  ;;  %v79_v30 = vld [vmem:[#allocation5 + $0x40] sm:$0xff]  ;;  %v126_v33 = vld [vmem:[#allocation5 + $0x1b8] sm:$0xff] }
  0x31   :  { %657 = vmatprep.subr.mxu1 %v130_v17  ;;  %623 = vmatpush3.msra.mxu0 %v82_v18  ;;  %v112_v27 = vld [vmem:[#allocation5 + $0x148] sm:$0xff]  ;;  %v111_v31 = vld [vmem:[#allocation5 + $0x140] sm:$0xff]  ;;  %v78_v34 = vld [vmem:[#allocation5 + $0x38] sm:$0xff] }
  0x32   :  { %658 = vmatpush3.msra.mxu1 %v114_v19  ;;  %624 = vmatprep.subr.mxu0 %v97_v20  ;;  %v110_v35 = vld [vmem:[#allocation5 + $0x138] sm:$0xff]  ;;  %v93_v36 = vld [vmem:[#allocation5 + $0xb0] sm:$0xff]  ;;  %v92_v40 = vld [vmem:[#allocation5 + $0xa8] sm:$0xff] }
  0x33   :  { %659 = vmatprep.subr.mxu1 %v129_v21  ;;  %625 = vmatpush3.msra.mxu0 %v81_v22  ;;  %v125_v37 = vld [vmem:[#allocation5 + $0x1b0] sm:$0xff]  ;;  %v124_v41 = vld [vmem:[#allocation5 + $0x1a8] sm:$0xff]  ;;  %v91_v44 = vld [vmem:[#allocation5 + $0xa0] sm:$0xff] }
  0x34   :  { %660 = vmatpush3.msra.mxu1 %v113_v23  ;;  %626 = vmatprep.subr.mxu0 %v96_v24  ;;  %v77_v38 = vld [vmem:[#allocation5 + $0x30] sm:$0xff]  ;;  %v76_v42 = vld [vmem:[#allocation5 + $0x28] sm:$0xff]  ;;  %v123_v45 = vld [vmem:[#allocation5 + $0x1a0] sm:$0xff] }
  0x35   :  { %661 = vmatprep.subr.mxu1 %v128_v25  ;;  %627 = vmatpush3.msra.mxu0 %v80_v26  ;;  %v109_v39 = vld [vmem:[#allocation5 + $0x130] sm:$0xff]  ;;  %v108_v43 = vld [vmem:[#allocation5 + $0x128] sm:$0xff]  ;;  %v75_v46 = vld [vmem:[#allocation5 + $0x20] sm:$0xff] }
  0x36   :  { %662 = vmatpush3.msra.mxu1 %v112_v27  ;;  %628 = vmatprep.subr.mxu0 %v95_v28  ;;  %v107_v47 = vld [vmem:[#allocation5 + $0x120] sm:$0xff]  ;;  %v90_v48 = vld [vmem:[#allocation5 + $0x98] sm:$0xff]  ;;  %v89_v52 = vld [vmem:[#allocation5 + $0x90] sm:$0xff] }
  0x37   :  { %663 = vmatprep.subr.mxu1 %v127_v29  ;;  %629 = vmatpush3.msra.mxu0 %v79_v30  ;;  %v122_v49 = vld [vmem:[#allocation5 + $0x198] sm:$0xff]  ;;  %v121_v53 = vld [vmem:[#allocation5 + $0x190] sm:$0xff]  ;;  %v88_v56 = vld [vmem:[#allocation5 + $0x88] sm:$0xff] }
  0x38   :  { %664 = vmatpush3.msra.mxu1 %v111_v31  ;;  %630 = vmatprep.subr.mxu0 %v94_v32  ;;  %v74_v50 = vld [vmem:[#allocation5 + $0x18] sm:$0xff]  ;;  %v73_v54 = vld [vmem:[#allocation5 + $0x10] sm:$0xff]  ;;  %v120_v57 = vld [vmem:[#allocation5 + $0x188] sm:$0xff] }
  0x39   :  { %665 = vmatprep.subr.mxu1 %v126_v33  ;;  %631 = vmatpush3.msra.mxu0 %v78_v34  ;;  %v106_v51 = vld [vmem:[#allocation5 + $0x118] sm:$0xff]  ;;  %v105_v55 = vld [vmem:[#allocation5 + $0x110] sm:$0xff]  ;;  %v72_v58 = vld [vmem:[#allocation5 + $0x8] sm:$0xff] }
  0x3a   :  { %666 = vmatpush3.msra.mxu1 %v110_v35  ;;  %632 = vmatprep.subr.mxu0 %v93_v36  ;;  %v104_v59 = vld [vmem:[#allocation5 + $0x108] sm:$0xff]  ;;  %v87_v60 = vld [vmem:[#allocation5 + $0x80] sm:$0xff]  ;;  %v66_v2 = vld [vmem:[#allocation2 + $0x18] sm:$0xff] }
  0x3b   :  { %667 = vmatprep.subr.mxu1 %v125_v37  ;;  %633 = vmatpush3.msra.mxu0 %v77_v38  ;;  %v119_v61 = vld [vmem:[#allocation5 + $0x180] sm:$0xff]  ;;  %v64_v63 = vld [vmem:[#allocation2 + $0x8] sm:$0xff]  ;;  %v166_v3 = vld [vmem:[#allocation5 + $0x2f8] sm:$0xff] }
  0x3c   :  { %668 = vmatpush3.msra.mxu1 %v109_v39  ;;  %634 = vmatprep.subr.mxu0 %v92_v40  ;;  %v71_v62 = vld [vmem:[#allocation5] sm:$0xff]  ;;  %v198_v4 = vld [vmem:[#allocation5 + $0x3f8] sm:$0xff]  ;;  %v65_v5 = vld [vmem:[#allocation2 + $0x10] sm:$0xff] }
  0x3d   :  { %669 = vmatprep.subr.mxu1 %v124_v41  ;;  %635 = vmatpush3.msra.mxu0 %v76_v42  ;;  %v103_v0 = vld [vmem:[#allocation5 + $0x100] sm:$0xff]  ;;  %v150_v6 = vld [vmem:[#allocation5 + $0x278] sm:$0xff]  ;;  %v165_v8 = vld [vmem:[#allocation5 + $0x2f0] sm:$0xff] }
  0x3e   :  { %670 = vmatpush3.msra.mxu1 %v108_v43  ;;  %636 = vmatprep.subr.mxu0 %v91_v44  ;;  %v63_v1 = vld [vmem:[#allocation2] sm:$0xff]  ;;  %v182_v7 = vld [vmem:[#allocation5 + $0x378] sm:$0xff]  ;;  %v197_v9 = vld [vmem:[#allocation5 + $0x3f0] sm:$0xff] }
  0x3f   :  { %671 = vmatprep.subr.mxu1 %v123_v45  ;;  %637 = vmatpush3.msra.mxu0 %v75_v46  ;;  %v149_v10 = vld [vmem:[#allocation5 + $0x270] sm:$0xff]  ;;  %v164_v12 = vld [vmem:[#allocation5 + $0x2e8] sm:$0xff]  ;;  %v163_v16 = vld [vmem:[#allocation5 + $0x2e0] sm:$0xff] }
  0x40   :  { %672 = vmatpush3.msra.mxu1 %v107_v47  ;;  %638 = vmatprep.subr.mxu0 %v90_v48  ;;  %v181_v11 = vld [vmem:[#allocation5 + $0x370] sm:$0xff]  ;;  %v196_v13 = vld [vmem:[#allocation5 + $0x3e8] sm:$0xff]  ;;  %v195_v17 = vld [vmem:[#allocation5 + $0x3e0] sm:$0xff] }
  0x41   :  { %673 = vmatprep.subr.mxu1 %v122_v49  ;;  %639 = vmatpush3.msra.mxu0 %v74_v50  ;;  %v148_v14 = vld [vmem:[#allocation5 + $0x268] sm:$0xff]  ;;  %v147_v18 = vld [vmem:[#allocation5 + $0x260] sm:$0xff]  ;;  %v162_v20 = vld [vmem:[#allocation5 + $0x2d8] sm:$0xff] }
  0x42   :  { %674 = vmatpush3.msra.mxu1 %v106_v51  ;;  %640 = vmatprep.subr.mxu0 %v89_v52  ;;  %v180_v15 = vld [vmem:[#allocation5 + $0x368] sm:$0xff]  ;;  %v179_v19 = vld [vmem:[#allocation5 + $0x360] sm:$0xff]  ;;  %v194_v21 = vld [vmem:[#allocation5 + $0x3d8] sm:$0xff] }
  0x43   :  { %675 = vmatprep.subr.mxu1 %v121_v53  ;;  %641 = vmatpush3.msra.mxu0 %v73_v54  ;;  %v146_v22 = vld [vmem:[#allocation5 + $0x258] sm:$0xff]  ;;  %v161_v24 = vld [vmem:[#allocation5 + $0x2d0] sm:$0xff]  ;;  %v160_v28 = vld [vmem:[#allocation5 + $0x2c8] sm:$0xff] }
  0x44   :  { %676 = vmatpush3.msra.mxu1 %v105_v55  ;;  %642 = vmatprep.subr.mxu0 %v88_v56  ;;  %v178_v23 = vld [vmem:[#allocation5 + $0x358] sm:$0xff]  ;;  %v193_v25 = vld [vmem:[#allocation5 + $0x3d0] sm:$0xff]  ;;  %v192_v29 = vld [vmem:[#allocation5 + $0x3c8] sm:$0xff] }
  0x45   :  { %677 = vmatprep.subr.mxu1 %v120_v57  ;;  %643 = vmatpush3.msra.mxu0 %v72_v58  ;;  %v145_v26 = vld [vmem:[#allocation5 + $0x250] sm:$0xff]  ;;  %v144_v30 = vld [vmem:[#allocation5 + $0x248] sm:$0xff]  ;;  %v159_v32 = vld [vmem:[#allocation5 + $0x2c0] sm:$0xff] }
  0x46   :  { %678 = vmatpush3.msra.mxu1 %v104_v59  ;;  %644 = vmatprep.subr.mxu0 %v87_v60  ;;  %v177_v27 = vld [vmem:[#allocation5 + $0x350] sm:$0xff]  ;;  %v176_v31 = vld [vmem:[#allocation5 + $0x348] sm:$0xff]  ;;  %v191_v33 = vld [vmem:[#allocation5 + $0x3c0] sm:$0xff] }
  0x47   :  { %679 = vmatprep.subr.mxu1 %v119_v61  ;;  %645 = vmatpush3.msra.mxu0 %v71_v62  ;;  %v143_v34 = vld [vmem:[#allocation5 + $0x240] sm:$0xff]  ;;  %v158_v36 = vld [vmem:[#allocation5 + $0x2b8] sm:$0xff]  ;;  %v157_v40 = vld [vmem:[#allocation5 + $0x2b0] sm:$0xff] }
  0x48   :  { %270 = vmatprep.mubr.f32.mxu0 %v64_v63  ;;  %680 = vmatpush3.msra.mxu1 %v103_v0  ;;  %v175_v35 = vld [vmem:[#allocation5 + $0x340] sm:$0xff]  ;;  %v190_v37 = vld [vmem:[#allocation5 + $0x3b8] sm:$0xff]  ;;  %v189_v41 = vld [vmem:[#allocation5 + $0x3b0] sm:$0xff] }
  0x49   :  { %271 = vmatmul.mubr.f32.vlgmr.msra.gmra.mxu0 %v63_v1  ;;  %340 = vmatprep.mubr.f32.mxu1 %v66_v2  ;;  %v142_v38 = vld [vmem:[#allocation5 + $0x238] sm:$0xff]  ;;  %v141_v42 = vld [vmem:[#allocation5 + $0x230] sm:$0xff]  ;;  %v156_v44 = vld [vmem:[#allocation5 + $0x2a8] sm:$0xff] }
  0x4a   :  { %684 = vmatprep.subr.mxu0 %v166_v3  ;;  %719 = vmatprep.subr.mxu1 %v198_v4  ;;  %v174_v39 = vld [vmem:[#allocation5 + $0x338] sm:$0xff]  ;;  %v173_v43 = vld [vmem:[#allocation5 + $0x330] sm:$0xff]  ;;  %v188_v45 = vld [vmem:[#allocation5 + $0x3a8] sm:$0xff] }
  0x4b   :  { %341 = vmatmul.mubr.f32.vlgmr.msra.gmra.mxu1 %v65_v5  ;;  %685 = vmatpush3.msra.mxu0 %v150_v6  ;;  %v140_v46 = vld [vmem:[#allocation5 + $0x228] sm:$0xff]  ;;  %v155_v48 = vld [vmem:[#allocation5 + $0x2a0] sm:$0xff]  ;;  %v154_v52 = vld [vmem:[#allocation5 + $0x298] sm:$0xff] }
  0x4c   :  { %720 = vmatpush3.msra.mxu1 %v182_v7  ;;  %686 = vmatprep.subr.mxu0 %v165_v8  ;;  %v172_v47 = vld [vmem:[#allocation5 + $0x328] sm:$0xff]  ;;  %v187_v49 = vld [vmem:[#allocation5 + $0x3a0] sm:$0xff]  ;;  %v186_v53 = vld [vmem:[#allocation5 + $0x398] sm:$0xff] }
  0x4d   :  { %721 = vmatprep.subr.mxu1 %v197_v9  ;;  %687 = vmatpush3.msra.mxu0 %v149_v10  ;;  %v139_v50 = vld [vmem:[#allocation5 + $0x220] sm:$0xff]  ;;  %v138_v54 = vld [vmem:[#allocation5 + $0x218] sm:$0xff]  ;;  %v153_v56 = vld [vmem:[#allocation5 + $0x290] sm:$0xff]  ;;  %v928_v9 = vmov 0.0  }
  0x4e   :  { %722 = vmatpush3.msra.mxu1 %v181_v11  ;;  %688 = vmatprep.subr.mxu0 %v164_v12  ;;  %v171_v51 = vld [vmem:[#allocation5 + $0x320] sm:$0xff]  ;;  %v170_v55 = vld [vmem:[#allocation5 + $0x318] sm:$0xff]  ;;  %v185_v57 = vld [vmem:[#allocation5 + $0x390] sm:$0xff] }
  0x4f   :  { %723 = vmatprep.subr.mxu1 %v196_v13  ;;  %689 = vmatpush3.msra.mxu0 %v148_v14  ;;  %v137_v58 = vld [vmem:[#allocation5 + $0x210] sm:$0xff]  ;;  %v152_v60 = vld [vmem:[#allocation5 + $0x288] sm:$0xff]  ;;  %v151_v0 = vld [vmem:[#allocation5 + $0x280] sm:$0xff] }
  0x50   :  { %724 = vmatpush3.msra.mxu1 %v180_v15  ;;  %690 = vmatprep.subr.mxu0 %v163_v16  ;;  %v169_v59 = vld [vmem:[#allocation5 + $0x310] sm:$0xff]  ;;  %v184_v61 = vld [vmem:[#allocation5 + $0x388] sm:$0xff]  ;;  %v183_v1 = vld [vmem:[#allocation5 + $0x380] sm:$0xff] }
  0x51   :  { %725 = vmatprep.subr.mxu1 %v195_v17  ;;  %691 = vmatpush3.msra.mxu0 %v147_v18  ;;  %v136_v62 = vld [vmem:[#allocation5 + $0x208] sm:$0xff]  ;;  %v135_v2 = vld [vmem:[#allocation5 + $0x200] sm:$0xff]  ;;  %v70_v5 = vld [vmem:[#allocation2 + $0x38] sm:$0xff] }
  0x52   :  { %726 = vmatpush3.msra.mxu1 %v179_v19  ;;  %692 = vmatprep.subr.mxu0 %v162_v20  ;;  %v168_v63 = vld [vmem:[#allocation5 + $0x308] sm:$0xff]  ;;  %v167_v4 = vld [vmem:[#allocation5 + $0x300] sm:$0xff]  ;;  %v69_v7 = vld [vmem:[#allocation2 + $0x30] sm:$0xff] }
  0x53   :  { %727 = vmatprep.subr.mxu1 %v194_v21  ;;  %693 = vmatpush3.msra.mxu0 %v146_v22  ;;  %v68_v3 = vld [vmem:[#allocation2 + $0x28] sm:$0xff]  ;;  %v67_v6 = vld [vmem:[#allocation2 + $0x20] sm:$0xff]  ;;  %v503_v8 = vld [vmem:[#allocation7 + $0x78] sm:$0xff] }
  0x54   :  { %728 = vmatpush3.msra.mxu1 %v178_v23  ;;  %694 = vmatprep.subr.mxu0 %v161_v24  ;;  %v502_v10 = vld [vmem:[#allocation7 + $0x70] sm:$0xff]  ;;  %v501_v11 = vld [vmem:[#allocation7 + $0x68] sm:$0xff]  ;;  %v500_v12 = vld [vmem:[#allocation7 + $0x60] sm:$0xff] }
  0x55   :  { %729 = vmatprep.subr.mxu1 %v193_v25  ;;  %695 = vmatpush3.msra.mxu0 %v145_v26  ;;  %v499_v13 = vld [vmem:[#allocation7 + $0x58] sm:$0xff]  ;;  %v498_v14 = vld [vmem:[#allocation7 + $0x50] sm:$0xff]  ;;  %v497_v15 = vld [vmem:[#allocation7 + $0x48] sm:$0xff] }
  0x56   :  { %730 = vmatpush3.msra.mxu1 %v177_v27  ;;  %696 = vmatprep.subr.mxu0 %v160_v28  ;;  %v496_v16 = vld [vmem:[#allocation7 + $0x40] sm:$0xff]  ;;  %v495_v17 = vld [vmem:[#allocation7 + $0x38] sm:$0xff]  ;;  %v494_v18 = vld [vmem:[#allocation7 + $0x30] sm:$0xff] }
  0x57   :  { %731 = vmatprep.subr.mxu1 %v192_v29  ;;  %697 = vmatpush3.msra.mxu0 %v144_v30  ;;  %v493_v19 = vld [vmem:[#allocation7 + $0x28] sm:$0xff]  ;;  %v492_v20 = vld [vmem:[#allocation7 + $0x20] sm:$0xff]  ;;  %v491_v21 = vld [vmem:[#allocation7 + $0x18] sm:$0xff] }
  0x58   :  { %732 = vmatpush3.msra.mxu1 %v176_v31  ;;  %698 = vmatprep.subr.mxu0 %v159_v32  ;;  %v490_v22 = vld [vmem:[#allocation7 + $0x10] sm:$0xff]  ;;  %v489_v23 = vld [vmem:[#allocation7 + $0x8] sm:$0xff]  ;;  %v488_v24 = vld [vmem:[#allocation7] sm:$0xff] }
  0x59   :  { %733 = vmatprep.subr.mxu1 %v191_v33  ;;  %699 = vmatpush3.msra.mxu0 %v143_v34  ;;  %v612_v29 = vld [vmem:[%s990_s2] ss:$0 sm:$0xff] }
  0x5a   :  { %734 = vmatpush3.msra.mxu1 %v175_v35  ;;  %700 = vmatprep.subr.mxu0 %v158_v36 }
  0x5b   :  { %735 = vmatprep.subr.mxu1 %v190_v37  ;;  %701 = vmatpush3.msra.mxu0 %v142_v38 }
  0x5c   :  { %736 = vmatpush3.msra.mxu1 %v174_v39  ;;  %702 = vmatprep.subr.mxu0 %v157_v40 }
  0x5d   :  { %737 = vmatprep.subr.mxu1 %v189_v41  ;;  %703 = vmatpush3.msra.mxu0 %v141_v42 }
  0x5e   :  { %738 = vmatpush3.msra.mxu1 %v173_v43  ;;  %704 = vmatprep.subr.mxu0 %v156_v44 }
  0x5f   :  { %739 = vmatprep.subr.mxu1 %v188_v45  ;;  %705 = vmatpush3.msra.mxu0 %v140_v46 }
  0x60   :  { %740 = vmatpush3.msra.mxu1 %v172_v47  ;;  %706 = vmatprep.subr.mxu0 %v155_v48 }
  0x61   :  { %741 = vmatprep.subr.mxu1 %v187_v49  ;;  %707 = vmatpush3.msra.mxu0 %v139_v50 }
  0x62   :  { %742 = vmatpush3.msra.mxu1 %v171_v51  ;;  %708 = vmatprep.subr.mxu0 %v154_v52 }
  0x63   :  { %743 = vmatprep.subr.mxu1 %v186_v53  ;;  %709 = vmatpush3.msra.mxu0 %v138_v54 }
  0x64   :  { %744 = vmatpush3.msra.mxu1 %v170_v55  ;;  %710 = vmatprep.subr.mxu0 %v153_v56 }
  0x65   :  { %745 = vmatprep.subr.mxu1 %v185_v57  ;;  %711 = vmatpush3.msra.mxu0 %v137_v58 }
  0x66   :  { %746 = vmatpush3.msra.mxu1 %v169_v59  ;;  %712 = vmatprep.subr.mxu0 %v152_v60 }
  0x67   :  { %747 = vmatprep.subr.mxu1 %v184_v61  ;;  %713 = vmatpush3.msra.mxu0 %v136_v62 }
  0x68   :  { %748 = vmatpush3.msra.mxu1 %v168_v63  ;;  %714 = vmatprep.subr.mxu0 %v151_v0 }
  0x69   :  { %749 = vmatprep.subr.mxu1 %v183_v1  ;;  %715 = vmatpush3.msra.mxu0 %v135_v2 }
  0x6a   :  { %410 = vmatprep.mubr.f32.mxu0 %v68_v3  ;;  %750 = vmatpush3.msra.mxu1 %v167_v4 }
  0x6b   :  { %480 = vmatprep.mubr.f32.mxu1 %v70_v5  ;;  %411 = vmatmul.mubr.f32.vlgmr.msra.gmra.mxu0 %v67_v6 }
  0x6c   :  { %481 = vmatmul.mubr.f32.vlgmr.msra.gmra.mxu1 %v69_v7  ;;  %771 = vmatprep.subr.mxu0 %v928_v9 }
  0x6d   :  { %772 = vmatpush3.msra.mxu0 %v503_v8  ;;  %803 = vmatprep.mubr.msk.f32.mxu0 %vm929_vm0, %v928_v9 }
  0x6e   :  { %773 = vmatprep.subr.mxu0 %v928_v9 }
  0x6f   :  { %774 = vmatpush3.msra.mxu0 %v502_v10 }
  0x70   :  { %775 = vmatprep.subr.mxu0 %v928_v9 }
  0x71   :  { %776 = vmatpush3.msra.mxu0 %v501_v11 }
  0x72   :  { %777 = vmatprep.subr.mxu0 %v928_v9 }
  0x73   :  { %778 = vmatpush3.msra.mxu0 %v500_v12 }
  0x74   :  { %779 = vmatprep.subr.mxu0 %v928_v9 }
  0x75   :  { %780 = vmatpush3.msra.mxu0 %v499_v13 }
  0x76   :  { %781 = vmatprep.subr.mxu0 %v928_v9 }
  0x77   :  { %782 = vmatpush3.msra.mxu0 %v498_v14 }
  0x78   :  { %783 = vmatprep.subr.mxu0 %v928_v9 }
  0x79   :  { %784 = vmatpush3.msra.mxu0 %v497_v15 }
  0x7a   :  { %785 = vmatprep.subr.mxu0 %v928_v9 }
  0x7b   :  { %786 = vmatpush3.msra.mxu0 %v496_v16 }
  0x7c   :  { %787 = vmatprep.subr.mxu0 %v928_v9 }
  0x7d   :  { %788 = vmatpush3.msra.mxu0 %v495_v17 }
  0x7e   :  { %789 = vmatprep.subr.mxu0 %v928_v9 }
  0x7f   :  { %790 = vmatpush3.msra.mxu0 %v494_v18 }
  0x80   :  { %791 = vmatprep.subr.mxu0 %v928_v9 }
  0x81   :  { %792 = vmatpush3.msra.mxu0 %v493_v19 }
  0x82   :  { %793 = vmatprep.subr.mxu0 %v928_v9 }
  0x83   :  { %794 = vmatpush3.msra.mxu0 %v492_v20 }
  0x84   :  { %795 = vmatprep.subr.mxu0 %v928_v9 }
  0x85   :  { %796 = vmatpush3.msra.mxu0 %v491_v21 }
  0x86   :  { %797 = vmatprep.subr.mxu0 %v928_v9 }
  0x87   :  { %798 = vmatpush3.msra.mxu0 %v490_v22 }
  0x88   :  { %799 = vmatprep.subr.mxu0 %v928_v9 }
  0x89   :  { %800 = vmatpush3.msra.mxu0 %v489_v23 }
  0x8a   :  { %801 = vmatprep.subr.mxu0 %v928_v9 }
  0x8b   :  { %802 = vmatpush3.msra.mxu0 %v488_v24 }
 0x109   :  { %v646_v25 = vpop.f32.mrf.mxu0 }
 0x10b   :  { %v681_v26 = vpop.f32.mrf.mxu1  ;;  %v647_v27 = vpop.f32.mrf.mxu0 }
 0x10c   :  { %v648_v28 = vadd.f32 %v647_v27, %v646_v25 }
 0x10d   :  { %v682_v30 = vpop.f32.mrf.mxu1 }
 0x10e   :  { %v273_v31 = vadd.f32 %v648_v28, %v612_v29  ;;  %v683_v32 = vadd.f32 %v682_v30, %v681_v26 }
 0x110   :  { %v343_v37 = vadd.f32 %v683_v32, %v273_v31 }
 0x12b   :  { %v716_v33 = vpop.f32.mrf.mxu0 }
 0x12c   :  { %v751_v34 = vpop.f32.mrf.mxu1 }
 0x12d   :  { %v717_v35 = vpop.f32.mrf.mxu0 }
 0x12e   :  { %v752_v36 = vpop.f32.mrf.mxu1  ;;  %v718_v38 = vadd.f32 %v717_v35, %v716_v33 }
 0x12f   :  { %v753_v40 = vadd.f32 %v752_v36, %v751_v34 }
 0x130   :  { %v413_v39 = vadd.f32 %v718_v38, %v343_v37 }
 0x132   :  { %v483_v41 = vadd.f32 %v753_v40, %v413_v39 }
 0x134   :  { %v486_v42 = vmax.f32 %v483_v41, 0.0 }
 0x136   :  { %487 = vst [vmem:[#allocation8] sm:$0xff] %v486_v42  ;;  %804 = vmatmul.mubr.f32.vlgmr.msra.gmra.mxu0 %v486_v42 }
 0x137   :  { %886 = shalt.err (!%p883_p5)
}
 0x138   :  { %591 = dma.vmem_to_hbm [thread:$0]  %s589_s14, 128, %s993_s5, [#allocation4]   ;;  %v613_v43 = vld [vmem:[%s992_s4] ss:$0 sm:$0xff] }
 0x139   :  { %s931_s19 = smov [#allocation9]  }
 0x13a   :  { %s598_s20 = sshll.u32 %s931_s19, 4  ;;  %s599_s20 = int_to_ptr.vmem [resolvable:$true] %s598_s20 }
 0x13b   :  { %s895_s21 = scalar_lea.vmem %s599_s20, 128  ;;  %p900_p7 = scmp.lt.s32.totalorder %s599_s20, %s599_s20 }
 0x13c   :  { %p896_p6 = scmp.ne.s32.totalorder %s599_s20, %s895_s21  ;;  %p901_p8 = scmp.lt.s32.totalorder %s895_s21, %s895_s21 }
 0x13e   :  { %p902_p9 = por %p901_p8, %p900_p7 }
 0x140   :  { %p903_p10 = pnand %p902_p9, %p896_p6 }
 0x1f6   :  { %v577_v44 = vpop.f32.mrf.mxu0 }
 0x1f7   :  { %v578_v45 = vadd.f32 %v613_v43, %v577_v44 }
 0x1f8   :  { %v805_v46 = vpop.f32.mrf.mxu0 }
 0x1f9   :  { %581 = vst [vmem:[#allocation9] sm:$0xff] %v578_v45 }
 0x1fa   :  { %906 = shalt.err (!%p903_p10)
}
 0x1fb   :  { %601 = dma.vmem_to_hbm [thread:$0]  %s599_s20, 128, %s994_s6, [#allocation10]  }
 0x1fc   :  { %919 = dma.done.wait [#allocation4], 128  }
 0x1fd   :  { %920 = vsyncadd [#allocation4], 4294967168 }
 0x1fe   :  { %921 = dma.done.wait [#allocation10], 128  }
 0x1ff   :  { %922 = vsyncadd [#allocation10], 4294967168 }
 0x200   :  { %608 = vsyncpa [#allocation3], 1 }
 0x201   :  { %609 = vsyncpa [#allocation6], 1 }
 0x202   :  { %610 = vsyncpa [#allocation4], 1 }
 0x203   :  { %611 = vsyncpa [#allocation10], 1 }

</bundles_post_ra>
